<compile_context>
chip_gen: v7x
topology: tpu7x:2x2x1
jax: 0.10.0
libtpu: 0.0.40
codegen_flags: <defaults>
</compile_context>

<pallas_src>
import jax
import jax.numpy as jnp
from jax import lax
from jax.experimental import pallas as pl
from jax.experimental.pallas import tpu as pltpu


def _round_up(v: int, m: int) -> int:
    return ((v + m - 1) // m) * m


def _cdiv(a: int, b: int) -> int:
    return -(-a // b)


def _make_mean_kernel(M: int, N: int, tm: int, nblocks: int, per_p: int):
    def mean_kernel(x_ref, o_ref, acc_ref):
        p = pl.program_id(0)          # parallel row super-block
        j = pl.program_id(1)          # reduction step within the super-block

        @pl.when(j == 0)
        def _init():
            acc_ref[...] = jnp.zeros_like(acc_ref)

        # Which logical row-block this step covers (clamped so the DMA window
        # stays the standard partial-last-block case; duplicates are masked out).
        bidx_raw = p * per_p + j
        bidx = jnp.minimum(bidx_raw, nblocks - 1)
        row0 = bidx * tm
        row_ids = lax.broadcasted_iota(jnp.int32, (tm, N), 0) + row0
        valid = (row_ids < M) & (bidx_raw < nblocks)

        # Pure VPU element-wise accumulate; fully hidden under the input DMA.
        acc_ref[...] += jnp.where(valid, x_ref[...], jnp.float32(0.0))

        @pl.when(j == pl.num_programs(1) - 1)
        def _finalize():
            # Single cross-lane/sublane reduce per parallel slice.
            o_ref[0, 0] = jnp.sum(acc_ref[...])

    return mean_kernel


def pallas_mean(x: jax.Array, *, target_block_bytes: int = 4 << 20) -> jax.Array:
    """Mean over all elements of a 2-D float32 array, computed in a Pallas kernel."""
    assert x.ndim == 2, "MeanDynamicSizesModule annotates x as rank-2"
    x = x.astype(jnp.float32)
    M, N = x.shape

    # Row-tile so each grid step moves ~target_block_bytes of f32 (multiple of 8 rows),
    # capped at the (padded) row count of the array.
    bytes_per_row = 4 * N
    tm = max(8, ((target_block_bytes // bytes_per_row) // 8) * 8)
    tm = min(tm, _round_up(M, 8))
    # TODO(synk): for extremely wide rows (8*N*4 bytes approaching VMEM), also tile
    # the N axis with a second reduction grid dim; not needed for these shapes.

    nblocks = _cdiv(M, tm)
    num_parallel = 2 if nblocks >= 2 else 1     # v7x: one slice per TensorCore
    per_p = _cdiv(nblocks, num_parallel)

    # 2 pipelined input buffers + 1 accumulator, plus margin; keep under v7x's 64 MiB.
    vmem_needed = 3 * tm * N * 4 + (4 << 20)
    vmem_limit = int(min(max(vmem_needed, 32 << 20), 60 << 20))

    kernel = _make_mean_kernel(M, N, tm, nblocks, per_p)

    def in_index(p, j):
        return (jnp.minimum(p * per_p + j, nblocks - 1), 0)

    partials = pl.pallas_call(
        kernel,
        out_shape=jax.ShapeDtypeStruct((num_parallel, 1), jnp.float32),
        grid_spec=pltpu.PrefetchScalarGridSpec(
            num_scalar_prefetch=0,
            grid=(num_parallel, per_p),
            in_specs=[pl.BlockSpec((tm, N), in_index)],
            out_specs=pl.BlockSpec((1, 1), lambda p, j: (p, 0),
                                   memory_space=pltpu.SMEM),
            scratch_shapes=[pltpu.VMEM((tm, N), jnp.float32)],
        ),
        compiler_params=pltpu.CompilerParams(
            dimension_semantics=("parallel", "arbitrary"),
            vmem_limit_bytes=vmem_limit,
        ),
    )(x)

    total = jnp.float32(M) * jnp.float32(N)
    # torch.ops.aten.mean(x) returns a 0-d tensor.
    return (jnp.sum(partials) / total).reshape(())


if __name__ == "__main__":
    key = jax.random.PRNGKey(0)
    k1, k2 = jax.random.split(key)

    # Small 2-D shape consistent with the ([-1, -1], float32) annotation.
    x = jax.random.normal(k1, (16, 128), dtype=jnp.float32)
    result = pallas_mean(x)
    jax.block_until_ready(result)
    ref = jnp.mean(x)
    assert result.shape == ()
    assert result.dtype == jnp.float32
    assert jnp.allclose(result, ref, rtol=1e-5, atol=1e-5), (result, ref)

    # Dynamic-size path: rows not divisible by the tile, multiple reduction steps,
    # both "parallel" slices active (exercises masking + partial-sum combine).
    x2 = jax.random.normal(k2, (300, 256), dtype=jnp.float32)
    result2 = pallas_mean(x2, target_block_bytes=64 * 1024)
    jax.block_until_ready(result2)
    ref2 = jnp.mean(x2)
    assert result2.shape == ()
    assert jnp.allclose(result2, ref2, rtol=1e-4, atol=1e-5), (result2, ref2)

    print("KERNEL_OK")
</pallas_src>

<mosaic_0001>
module attributes {stable_mosaic.version = 11 : i64} {
  func.func @mean_kernel(%arg0: i32, %arg1: i32, %arg2: memref<16x128xf32, #tpu.memory_space<vmem>>, %arg3: memref<1x1xf32, #tpu.memory_space<smem>>, %arg4: memref<16x128xf32, #tpu.memory_space<vmem>>) attributes {dimension_semantics = [#tpu.dimension_semantics<parallel>, #tpu.dimension_semantics<arbitrary>], iteration_bounds = array<i64: 1, 1>, scalar_prefetch = 0 : i64, scratch_operands = 1 : i64, tpu.core_type = #tpu.core_type<tc>, window_params = [{transform_indices = @transform_0, window_bounds = array<i64: 16, 128>}, {transform_indices = @transform_1, window_bounds = array<i64: 1, 1>}]} {
    %c0_i32 = arith.constant 0 : i32
    %0 = arith.cmpi eq, %arg1, %c0_i32 : i32
    %1 = arith.extui %0 : i1 to i32
    %c0_i32_0 = arith.constant 0 : i32
    %2 = arith.cmpi ne, %1, %c0_i32_0 : i32
    scf.if %2 {
      %cst_11 = arith.constant 0.000000e+00 : f32
      %24 = vector.broadcast %cst_11 : f32 to vector<16x128xf32>
      %c0_12 = arith.constant 0 : index
      %c0_13 = arith.constant 0 : index
      %25 = vector.load %arg4[%c0_12, %c0_13] : memref<16x128xf32, #tpu.memory_space<vmem>>, vector<16x128xf32>
      tpu.vector_store %arg4[%c0_12, %c0_13], %24 {strides = array<i32>} : memref<16x128xf32, #tpu.memory_space<vmem>>, vector<16x128xf32>,
    } else {
    }
    %c1_i32 = arith.constant 1 : i32
    %3 = arith.muli %arg0, %c1_i32 : i32
    %4 = arith.addi %3, %arg1 : i32
    %c0_i32_1 = arith.constant 0 : i32
    %5 = arith.minsi %4, %c0_i32_1 : i32
    %c16_i32 = arith.constant 16 : i32
    %6 = arith.muli %5, %c16_i32 : i32
    %7 = tpu.iota {dimensions = array<i32: 0>} : vector<16x128xi32>
    %8 = vector.broadcast %6 : i32 to vector<16x128xi32>
    %9 = arith.addi %7, %8 : vector<16x128xi32>
    %c16_i32_2 = arith.constant 16 : i32
    %10 = vector.broadcast %c16_i32_2 : i32 to vector<16x128xi32>
    %11 = arith.cmpi slt, %9, %10 : vector<16x128xi32>
    %c1_i32_3 = arith.constant 1 : i32
    %12 = arith.cmpi slt, %4, %c1_i32_3 : i32
    %13 = vector.broadcast %12 : i1 to vector<16x128xi1>
    %14 = arith.andi %11, %13 : vector<16x128xi1>
    %c0 = arith.constant 0 : index
    %c0_4 = arith.constant 0 : index
    %15 = vector.load %arg4[%c0, %c0_4] : memref<16x128xf32, #tpu.memory_space<vmem>>, vector<16x128xf32>
    %c0_5 = arith.constant 0 : index
    %c0_6 = arith.constant 0 : index
    %16 = vector.load %arg2[%c0_5, %c0_6] : memref<16x128xf32, #tpu.memory_space<vmem>>, vector<16x128xf32>
    %cst = arith.constant 0.000000e+00 : f32
    %17 = vector.broadcast %cst : f32 to vector<16x128xf32>
    %18 = arith.select %14, %16, %17 : vector<16x128xi1>, vector<16x128xf32>
    %19 = arith.addf %15, %18 : vector<16x128xf32>
    %c0_7 = arith.constant 0 : index
    %c0_8 = arith.constant 0 : index
    %20 = vector.load %arg4[%c0_7, %c0_8] : memref<16x128xf32, #tpu.memory_space<vmem>>, vector<16x128xf32>
    tpu.vector_store %arg4[%c0_7, %c0_8], %19 {strides = array<i32>} : memref<16x128xf32, #tpu.memory_space<vmem>>, vector<16x128xf32>,
    %c0_i32_9 = arith.constant 0 : i32
    %21 = arith.cmpi eq, %arg1, %c0_i32_9 : i32
    %22 = arith.extui %21 : i1 to i32
    %c0_i32_10 = arith.constant 0 : i32
    %23 = arith.cmpi ne, %22, %c0_i32_10 : i32
    scf.if %23 {
      %c0_11 = arith.constant 0 : index
      %c0_12 = arith.constant 0 : index
      %24 = vector.load %arg4[%c0_11, %c0_12] : memref<16x128xf32, #tpu.memory_space<vmem>>, vector<16x128xf32>
      %25 = vector.shape_cast %24 : vector<16x128xf32> to vector<1x16x128xf32>
      %cst_13 = arith.constant dense<0.000000e+00> : vector<1xf32>
      %26 = vector.multi_reduction <add>, %25, %cst_13 [1, 2] : vector<1x16x128xf32> to vector<1xf32>
      %27 = vector.shape_cast %26 : vector<1xf32> to vector<1x1x1xf32>
      %28 = vector.extract %27[0, 0, 0] : f32 from vector<1x1x1xf32>
      %c0_14 = arith.constant 0 : index
      %c0_15 = arith.constant 0 : index
      %29 = memref.load %arg3[%c0_14, %c0_15] : memref<1x1xf32, #tpu.memory_space<smem>>
      memref.store %28, %arg3[%c0_14, %c0_15] : memref<1x1xf32, #tpu.memory_space<smem>>
    } else {
    }
    return
  }
  func.func @transform_0(%arg0: i32, %arg1: i32) -> (i32, i32) {
    %c1_i32 = arith.constant 1 : i32
    %0 = arith.muli %arg0, %c1_i32 : i32
    %1 = arith.addi %0, %arg1 : i32
    %c0_i32 = arith.constant 0 : i32
    %2 = arith.minsi %1, %c0_i32 : i32
    %c0_i32_0 = arith.constant 0 : i32
    %c0_i32_1 = arith.constant 0 : i32
    return %2, %c0_i32_0 : i32, i32
  }
  func.func @transform_1(%arg0: i32, %arg1: i32) -> (i32, i32) {
    %c0_i32 = arith.constant 0 : i32
    %c0_i32_0 = arith.constant 0 : i32
    return %arg0, %c0_i32 : i32, i32
  }
}

</mosaic_0001>

<bundles_post_ra>
// kernel: tpu_custom_call.1
= control target key start
LH: loop header
LB: loop body
LE: loop exit
PB: predicated region body
PF: predicated region fallthrough
CT: control target
= control target key end

     0   :  { %6 = vsyncpa [#allocation4], 0  ;;  %s180_s0 = inlined_call_operand.hbm [shape: f32[16,128], index: 0, kind: input, shape index: {}]   ;;  %s181_s1 = inlined_call_operand.hbm [shape: f32[1,1], index: 1, kind: output, shape index: {}]  }
   0x1   :  { %7 = vsyncpa [#allocation5], 0  ;;  %s142_s6 = smov [#allocation3]   ;;  %s106_s10 = scalar_lea.hbm %s180_s0, 256 }
   0x2   :  { %s19_s7 = sshll.u32 %s142_s6, 4  ;;  %p107_p0 = scmp.ne.s32.totalorder %s180_s0, %s106_s10  ;;  %s20_s7 = int_to_ptr.vmem [resolvable:$true] %s19_s7 }
   0x3   :  { %p110_p1 = scmp.lt.u32.totalorder %s106_s10, %s180_s0 }
   0x5   :  { %p112_p2 = pnand %p110_p1, %p107_p0 }
   0x7   :  { %115 = shalt.err (!%p112_p2)
}
   0x8   :  { %s116_s15 = scalar_lea.vmem %s20_s7, 256  ;;  %p121_p4 = scmp.lt.s32.totalorder %s20_s7, %s20_s7 }
   0x9   :  { %p117_p3 = scmp.ne.s32.totalorder %s20_s7, %s116_s15  ;;  %p122_p5 = scmp.lt.s32.totalorder %s116_s15, %s116_s15 }
   0xb   :  { %p123_p6 = por %p122_p5, %p121_p4 }
   0xd   :  { %p124_p7 = pnand %p123_p6, %p117_p3 }
   0xf   :  { %127 = shalt.err (!%p124_p7)
}
  0x10   :  { %s143_s16 = smov 128   ;;  %s144_s17 = smov 8  }
  0x11   :  { %25 = dma.hbm_to_vmem [thread:$0]  %s180_s0, 256, %s20_s7, [#allocation4], %s143_s16, %s143_s16, %s144_s17  }
  0x12   :  { %138 = dma.done.wait [#allocation4], 256  }
  0x13   :  { %139 = vsyncadd [#allocation4], 4294967040  ;;  %v59_v0 = vld [vmem:[#allocation3] sm:$0xff]  ;;  %v60_v1 = vld [vmem:[#allocation3 + $0x8] sm:$0xff]  ;;  %s128_s0 = scalar_lea.hbm %s181_s1, 16 }
  0x14   :  { %v72_v2 = vadd.f32 %v60_v1, %v59_v0  ;;  %p129_p8 = scmp.ne.s32.totalorder %s181_s1, %s128_s0  ;;  %p132_p9 = scmp.lt.u32.totalorder %s128_s0, %s181_s1 }
  0x16   :  { %73 = vadd.xlane.f32.xlu0 %v72_v2  ;;  %p134_p10 = pnand %p132_p9, %p129_p8 }
  0xa3   :  { %v74_v3 = vpop.xlane.xlu0 %73 }
  0xa4   :  { %v75_v4 = vrot.slane %v74_v3, 4 }
  0xa6   :  { %v76_v5 = vadd.f32 %v75_v4, %v74_v3 }
  0xa8   :  { %v77_v6 = vrot.slane %v76_v5, 2 }
  0xaa   :  { %v78_v7 = vadd.f32 %v77_v6, %v76_v5 }
  0xac   :  { %v79_v8 = vrot.slane %v78_v7, 1 }
  0xae   :  { %v80_v9 = vadd.f32 %v79_v8, %v78_v7 }
  0xb0   :  { %100 = vpush %v80_v9 }
  0xe1   :  { %s101_s20 = spop %100 }
  0xe2   :  { %83 = sst [smem:[#allocation6]] %s101_s20 }
  0xe3   :  { %137 = shalt.err (!%p134_p10)
}
  0xe4   :  { %s145_s27 = smov [#allocation6]  }
  0xe5   :  { %91 = dma.smem_to_hbm %s145_s27, 16, %s181_s1, [#allocation5]  }
  0xe6   :  { %140 = dma.done.wait [#allocation5], 16  }
  0xe7   :  { %141 = vsyncadd [#allocation5], 4294967280 }
  0xe8   :  { %95 = sfence }
  0xe9   :  { %96 = vsyncpa [#allocation4], 1 }
  0xea   :  { %97 = vsyncpa [#allocation5], 1 }

</bundles_post_ra>
